<compile_context>
chip_gen: v7x
topology: tpu7x:2x2x1
jax: 0.10.0
libtpu: 0.0.40
codegen_flags: <defaults>
</compile_context>

<pallas_src>
import functools

import jax
import jax.numpy as jnp
from jax.experimental import pallas as pl
from jax.experimental.pallas import tpu as pltpu

_LANE = 128
_SUB = 8


def _round_up(a, b):
    return (a + b - 1) // b * b


def _round_down(a, b):
    return (a // b) * b


def _concat_pool_kernel(x_ref, out_ref, max_acc, sum_acc, *,
                        inv_hw, hw_total, thw, mask_spatial, use_mxu_sum):
    """One (row-block i, spatial-block j) grid step.

    x_ref   : (tr, thw) tile of the (N*C, H*W)-flattened input.
    out_ref : (2, tr) lane-dense output tile  (row 0 = max, row 1 = avg).
    max_acc / sum_acc : (1, tr) f32 running reductions across the j axis.
    """
    j = pl.program_id(1)
    n_j = pl.num_programs(1)

    x = x_ref[...]

    if mask_spatial:
        # Last spatial block is partial: neutralize out-of-range lanes
        # (-inf for max, 0 for sum) so stale VMEM cannot leak into the result.
        col = jax.lax.broadcasted_iota(jnp.int32, x.shape, 1) + j * thw
        valid = col < hw_total
        x_max_in = jnp.where(valid, x, -jnp.inf)
        x_sum_in = jnp.where(valid, x, 0.0)
    else:
        x_max_in = x
        x_sum_in = x

    # Row-wise max: lane-axis reduce (XLU).
    part_max = jnp.max(x_max_in, axis=-1, keepdims=True).astype(jnp.float32)  # (tr, 1)

    # Row-wise sum with f32 accumulation.
    if use_mxu_sum:
        # Narrow spatial tile: do the sum on the (idle) MXU so the XLU only
        # carries the max and small-H*W shapes stay DMA-bound.
        ones = jnp.ones((x.shape[-1], 1), dtype=x.dtype)
        part_sum = jnp.dot(x_sum_in, ones,
                           preferred_element_type=jnp.float32)                # (tr, 1)
    else:
        part_sum = jnp.sum(x_sum_in.astype(jnp.float32), axis=-1, keepdims=True)

    # Relayout the tiny (tr, 1) partials into lane-dense (1, tr) rows so the
    # accumulators stay small and the output store is an unmasked, lane-dense vst.
    pm = jnp.transpose(part_max, (1, 0))   # (1, tr)
    ps = jnp.transpose(part_sum, (1, 0))   # (1, tr)

    @pl.when(j == 0)
    def _init():
        max_acc[...] = pm
        sum_acc[...] = ps

    @pl.when(j > 0)
    def _accumulate():
        max_acc[...] = jnp.maximum(max_acc[...], pm)
        sum_acc[...] = sum_acc[...] + ps

    @pl.when(j == n_j - 1)
    def _finalize():
        out_ref[...] = jnp.concatenate(
            [max_acc[...], sum_acc[...] * inv_hw], axis=0
        ).astype(out_ref.dtype)


def _choose_tiles(R, HW, itemsize, target_block_bytes):
    """Pick (tr, thw) so one input block is ~target_block_bytes (padded)."""
    hw_pad = _round_up(HW, _LANE)
    # Minimum legal row tile: tr must be a multiple of 128 (lane-dense output
    # block) unless it equals R.
    tr_min = R if R <= _LANE else _LANE
    tr_min_pad = _round_up(tr_min, _SUB)

    if tr_min_pad * hw_pad * itemsize <= target_block_bytes:
        # Common case: the whole H*W fits in one block -> no reduction tiling.
        thw = HW
        if R <= 2 * _LANE:
            tr = R                                   # tiny problem: one block
        else:
            tr_budget = _round_down(target_block_bytes // (hw_pad * itemsize), _LANE)
            # Keep at least 2 (usually 4+) row blocks so both v7x TensorCores
            # get work and the pipeline can overlap DMA with compute.
            tr_steps = max(_LANE, _round_down(R // 4, _LANE))
            tr = max(_LANE, min(tr_budget, tr_steps))
    else:
        # Very large spatial extent: tile H*W (reduction axis, last in grid).
        tr = tr_min
        thw = max(_LANE, _round_down(target_block_bytes // (tr_min_pad * itemsize),
                                     _LANE))
    return tr, thw


def adaptive_concat_pool2d(x, *, target_block_bytes=8 * 1024 * 1024):
    """AdaptiveConcatPool2d(sz=1): (N, C, H, W) -> (N, 2C, 1, 1) = cat([max, avg], 1)."""
    N, C, H, W = x.shape
    R, HW = N * C, H * W
    itemsize = jnp.dtype(x.dtype).itemsize

    tr, thw = _choose_tiles(R, HW, itemsize, target_block_bytes)
    ni, nj = pl.cdiv(R, tr), pl.cdiv(HW, thw)
    mask_spatial = (thw < HW) and (HW % thw != 0)
    use_mxu_sum = thw <= 512

    # VMEM accounting against the padded (8,128) tiled layout -> explicit limit.
    tr_pad8, tr_pad128 = _round_up(tr, _SUB), _round_up(tr, _LANE)
    thw_pad128 = _round_up(thw, _LANE)
    in_bytes = 2 * tr_pad8 * thw_pad128 * itemsize          # double-buffered input
    out_bytes = 2 * _SUB * tr_pad128 * itemsize             # (2, tr) block, 2 buffers
    acc_bytes = 2 * _SUB * tr_pad128 * 4                    # two (1, tr) f32 scratch
    ones_bytes = _round_up(thw, _SUB) * _LANE * itemsize if use_mxu_sum else 0
    vmem_needed = in_bytes + out_bytes + acc_bytes + ones_bytes
    # Headroom for compiler scratch; stay well under v7x's 64 MiB physical VMEM.
    vmem_limit = int(min(max(vmem_needed + (4 << 20), 16 << 20), 56 << 20))

    kernel = functools.partial(
        _concat_pool_kernel,
        inv_hw=1.0 / float(HW),
        hw_total=HW,
        thw=thw,
        mask_spatial=mask_spatial,
        use_mxu_sum=use_mxu_sum,
    )

    x_flat = x.reshape(R, HW)

    out = pl.pallas_call(
        kernel,
        out_shape=jax.ShapeDtypeStruct((2, R), x.dtype),
        grid_spec=pltpu.PrefetchScalarGridSpec(
            num_scalar_prefetch=0,
            grid=(ni, nj),
            in_specs=[pl.BlockSpec((tr, thw), lambda i, j: (i, j))],
            out_specs=pl.BlockSpec((2, tr), lambda i, j: (0, i)),
            scratch_shapes=[
                pltpu.VMEM((1, tr), jnp.float32),   # running max
                pltpu.VMEM((1, tr), jnp.float32),   # running sum
            ],
        ),
        compiler_params=pltpu.CompilerParams(
            # Row blocks independent -> megacore sharding; reduction axis last.
            dimension_semantics=("parallel", "arbitrary"),
            vmem_limit_bytes=vmem_limit,
        ),
    )(x_flat)

    mx = out[0].reshape(N, C)
    av = out[1].reshape(N, C)
    # torch.cat([mp(x), ap(x)], 1): max channels first, then avg channels.
    return jnp.concatenate([mx, av], axis=1).reshape(N, 2 * C, 1, 1)


if __name__ == "__main__":
    key = jax.random.PRNGKey(0)
    k1, k2, k3, k4 = jax.random.split(key, 4)

    def reference(x):
        n, c = x.shape[:2]
        mx = jnp.max(x, axis=(2, 3))
        av = jnp.mean(x, axis=(2, 3))
        return jnp.concatenate([mx, av], axis=1).reshape(n, 2 * c, 1, 1)

    # 1) Primary check: small shape consistent with the module (default tiling:
    #    single block, full H*W, MXU-assisted sum).
    x1 = jax.random.normal(k1, (2, 4, 16, 16), dtype=jnp.float32)
    y1 = adaptive_concat_pool2d(x1)
    jax.block_until_ready(y1)
    assert y1.shape == (2, 8, 1, 1)
    assert jnp.allclose(y1, reference(x1), atol=1e-5, rtol=1e-5)

    # 2) Multiple row blocks + spatial (reduction-axis) tiling with partial
    #    (masked) last blocks on BOTH axes; small target forces the tiling.
    x2 = jax.random.normal(k2, (2, 150, 20, 20), dtype=jnp.float32)
    y2 = adaptive_concat_pool2d(x2, target_block_bytes=1 << 17)
    jax.block_until_ready(y2)
    assert jnp.allclose(y2, reference(x2), atol=1e-5, rtol=1e-5)

    # 3) Wide-spatial path: evenly split H*W accumulation, VPU/XLU sum path.
    x3 = jax.random.normal(k3, (1, 4, 64, 64), dtype=jnp.float32)
    y3 = adaptive_concat_pool2d(x3, target_block_bytes=1 << 16)
    jax.block_until_ready(y3)
    assert jnp.allclose(y3, reference(x3), atol=1e-5, rtol=1e-5)

    # 4) bf16 input: bf16 MXU sum with f32 accumulation.
    x4 = jax.random.normal(k4, (2, 4, 16, 16), dtype=jnp.bfloat16)
    y4 = adaptive_concat_pool2d(x4)
    jax.block_until_ready(y4)
    assert jnp.allclose(y4.astype(jnp.float32),
                        reference(x4.astype(jnp.float32)),
                        atol=1e-2, rtol=1e-2)

    print("KERNEL_OK")
</pallas_src>

<mosaic_0001>
module attributes {stable_mosaic.version = 11 : i64} {
  func.func @_concat_pool_kernel(%arg0: i32, %arg1: i32, %arg2: memref<8x256xf32, #tpu.memory_space<vmem>>, %arg3: memref<2x8xf32, #tpu.memory_space<vmem>>, %arg4: memref<1x8xf32, #tpu.memory_space<vmem>>, %arg5: memref<1x8xf32, #tpu.memory_space<vmem>>) attributes {dimension_semantics = [#tpu.dimension_semantics<parallel>, #tpu.dimension_semantics<arbitrary>], iteration_bounds = array<i64: 1, 1>, scalar_prefetch = 0 : i64, scratch_operands = 2 : i64, tpu.core_type = #tpu.core_type<tc>, window_params = [{transform_indices = @transform_0, window_bounds = array<i64: 8, 256>}, {transform_indices = @transform_1, window_bounds = array<i64: 2, 8>}]} {
    %c0 = arith.constant 0 : index
    %c0_0 = arith.constant 0 : index
    %0 = vector.load %arg2[%c0, %c0_0] : memref<8x256xf32, #tpu.memory_space<vmem>>, vector<8x256xf32>
    %cst = arith.constant dense<0xFF800000> : vector<8xf32>
    %1 = vector.multi_reduction <maximumf>, %0, %cst [1] : vector<8x256xf32> to vector<8xf32>
    %2 = vector.shape_cast %1 : vector<8xf32> to vector<8x1xf32>
    %cst_1 = arith.constant 1.000000e+00 : f32
    %3 = vector.broadcast %cst_1 : f32 to vector<256x1xf32>
    %cst_2 = arith.constant dense<0.000000e+00> : vector<8x1xf32>
    %4 = tpu.matmul %0, %3, %cst_2 {dimension_numbers = #tpu.dot_dimension_numbers<[1], [0], [0], [1], [0, 0, 1, 1], [], []>} : vector<8x256xf32>, vector<256x1xf32>, vector<8x1xf32> -> vector<8x1xf32>
    %5 = tpu.transpose %2, [1, 0] : vector<8x1xf32> -> vector<1x8xf32>
    %6 = tpu.transpose %4, [1, 0] : vector<8x1xf32> -> vector<1x8xf32>
    %c0_i32 = arith.constant 0 : i32
    %7 = arith.cmpi eq, %arg1, %c0_i32 : i32
    %8 = arith.extui %7 : i1 to i32
    %c0_i32_3 = arith.constant 0 : i32
    %9 = arith.cmpi ne, %8, %c0_i32_3 : i32
    scf.if %9 {
      %c0_8 = arith.constant 0 : index
      %c0_9 = arith.constant 0 : index
      %16 = vector.load %arg4[%c0_8, %c0_9] : memref<1x8xf32, #tpu.memory_space<vmem>>, vector<1x8xf32>
      tpu.vector_store %arg4[%c0_8, %c0_9], %5 {strides = array<i32>} : memref<1x8xf32, #tpu.memory_space<vmem>>, vector<1x8xf32>,
      %c0_10 = arith.constant 0 : index
      %c0_11 = arith.constant 0 : index
      %17 = vector.load %arg5[%c0_10, %c0_11] : memref<1x8xf32, #tpu.memory_space<vmem>>, vector<1x8xf32>
      tpu.vector_store %arg5[%c0_10, %c0_11], %6 {strides = array<i32>} : memref<1x8xf32, #tpu.memory_space<vmem>>, vector<1x8xf32>,
    } else {
    }
    %c0_i32_4 = arith.constant 0 : i32
    %10 = arith.cmpi sgt, %arg1, %c0_i32_4 : i32
    %11 = arith.extui %10 : i1 to i32
    %c0_i32_5 = arith.constant 0 : i32
    %12 = arith.cmpi ne, %11, %c0_i32_5 : i32
    scf.if %12 {
      %c0_8 = arith.constant 0 : index
      %c0_9 = arith.constant 0 : index
      %16 = vector.load %arg4[%c0_8, %c0_9] : memref<1x8xf32, #tpu.memory_space<vmem>>, vector<1x8xf32>
      %17 = arith.maximumf %16, %5 : vector<1x8xf32>
      %c0_10 = arith.constant 0 : index
      %c0_11 = arith.constant 0 : index
      %18 = vector.load %arg4[%c0_10, %c0_11] : memref<1x8xf32, #tpu.memory_space<vmem>>, vector<1x8xf32>
      tpu.vector_store %arg4[%c0_10, %c0_11], %17 {strides = array<i32>} : memref<1x8xf32, #tpu.memory_space<vmem>>, vector<1x8xf32>,
      %c0_12 = arith.constant 0 : index
      %c0_13 = arith.constant 0 : index
      %19 = vector.load %arg5[%c0_12, %c0_13] : memref<1x8xf32, #tpu.memory_space<vmem>>, vector<1x8xf32>
      %20 = arith.addf %19, %6 : vector<1x8xf32>
      %c0_14 = arith.constant 0 : index
      %c0_15 = arith.constant 0 : index
      %21 = vector.load %arg5[%c0_14, %c0_15] : memref<1x8xf32, #tpu.memory_space<vmem>>, vector<1x8xf32>
      tpu.vector_store %arg5[%c0_14, %c0_15], %20 {strides = array<i32>} : memref<1x8xf32, #tpu.memory_space<vmem>>, vector<1x8xf32>,
    } else {
    }
    %c0_i32_6 = arith.constant 0 : i32
    %13 = arith.cmpi eq, %arg1, %c0_i32_6 : i32
    %14 = arith.extui %13 : i1 to i32
    %c0_i32_7 = arith.constant 0 : i32
    %15 = arith.cmpi ne, %14, %c0_i32_7 : i32
    scf.if %15 {
      %c0_8 = arith.constant 0 : index
      %c0_9 = arith.constant 0 : index
      %16 = vector.load %arg4[%c0_8, %c0_9] : memref<1x8xf32, #tpu.memory_space<vmem>>, vector<1x8xf32>
      %c0_10 = arith.constant 0 : index
      %c0_11 = arith.constant 0 : index
      %17 = vector.load %arg5[%c0_10, %c0_11] : memref<1x8xf32, #tpu.memory_space<vmem>>, vector<1x8xf32>
      %cst_12 = arith.constant 3.906250e-03 : f32
      %18 = vector.broadcast %cst_12 : f32 to vector<1x8xf32>
      %19 = arith.mulf %17, %18 : vector<1x8xf32>
      %20 = tpu.concatenate %16, %19 in 0 : vector<1x8xf32>, vector<1x8xf32> -> vector<2x8xf32>
      %c0_13 = arith.constant 0 : index
      %c0_14 = arith.constant 0 : index
      %21 = vector.load %arg3[%c0_13, %c0_14] : memref<2x8xf32, #tpu.memory_space<vmem>>, vector<2x8xf32>
      tpu.vector_store %arg3[%c0_13, %c0_14], %20 {strides = array<i32>} : memref<2x8xf32, #tpu.memory_space<vmem>>, vector<2x8xf32>,
    } else {
    }
    return
  }
  func.func @transform_0(%arg0: i32, %arg1: i32) -> (i32, i32) {
    %c0_i32 = arith.constant 0 : i32
    return %arg0, %arg1 : i32, i32
  }
  func.func @transform_1(%arg0: i32, %arg1: i32) -> (i32, i32) {
    %c0_i32 = arith.constant 0 : i32
    %c0_i32_0 = arith.constant 0 : i32
    return %c0_i32, %arg0 : i32, i32
  }
}

</mosaic_0001>

<bundles_post_ra>
// kernel: tpu_custom_call.1
= control target key start
LH: loop header
LB: loop body
LE: loop exit
PB: predicated region body
PF: predicated region fallthrough
CT: control target
= control target key end

     0   :  { %6 = vsyncpa [#allocation5], 0  ;;  %s349_s0 = inlined_call_operand.hbm [shape: f32[8,256], index: 0, kind: input, shape index: {}]   ;;  %s350_s1 = inlined_call_operand.hbm [shape: f32[2,8], index: 1, kind: output, shape index: {}]  }
   0x1   :  { %7 = vsyncpa [#allocation6], 0  ;;  %s312_s6 = smov [#allocation4]   ;;  %s264_s10 = scalar_lea.hbm %s349_s0, 256 }
   0x2   :  { %s14_s7 = sshll.u32 %s312_s6, 4  ;;  %p265_p0 = scmp.ne.s32.totalorder %s349_s0, %s264_s10  ;;  %s15_s7 = int_to_ptr.vmem [resolvable:$true] %s14_s7 }
   0x3   :  { %p268_p1 = scmp.lt.u32.totalorder %s264_s10, %s349_s0 }
   0x5   :  { %p270_p2 = pnand %p268_p1, %p265_p0 }
   0x7   :  { %273 = shalt.err (!%p270_p2)
}
   0x8   :  { %s274_s15 = scalar_lea.vmem %s15_s7, 256  ;;  %p279_p4 = scmp.lt.s32.totalorder %s15_s7, %s15_s7 }
   0x9   :  { %p275_p3 = scmp.ne.s32.totalorder %s15_s7, %s274_s15  ;;  %p280_p5 = scmp.lt.s32.totalorder %s274_s15, %s274_s15 }
   0xb   :  { %p281_p6 = por %p280_p5, %p279_p4 }
   0xd   :  { %p282_p7 = pnand %p281_p6, %p275_p3 }
   0xf   :  { %285 = shalt.err (!%p282_p7)
}
  0x10   :  { %17 = dma.hbm_to_vmem [thread:$0]  %s349_s0, 256, %s15_s7, [#allocation5]  }
  0x11   :  { %308 = dma.done.wait [#allocation5], 256  }
  0x12   :  { %309 = vsyncadd [#allocation5], 4294967040  ;;  %v313_v0 = vmov 1.0|1.0   ;;  %v22_v1 = vld [vmem:[#allocation4 + $0x8] sm:$0xff]  ;;  %v21_v2 = vld [vmem:[#allocation4] sm:$0xff]  ;;  %v185_v9 = vlaneseq }
  0x13   :  { %244 = vmatprep.subr.bf16.mxu0 %v313_v0  ;;  %90 = vmatprep.mubr.f32.mxu0 %v22_v1  ;;  %v23_v3 = vmax.f32 %v21_v2, %v22_v1  ;;  %vm164_vm0 = vcmask 57344   ;;  %s314_s0 = smov [#allocation7]   ;;  %vm190_vm1 = vcmask 1040384   ;;  %vm192_vm2 = vcmask 58368  }
  0x14   :  { %245 = vmatpush3.bf16.msra.mxu0 %v313_v0  ;;  %v186_v11 = vshrl.u32 %v185_v9, 7  ;;  %s200_s18 = sshll.u32 %s314_s0, 4  ;;  %s201_s18 = int_to_ptr.vmem [resolvable:$true] %s200_s18 }
  0x15   :  { %246 = vmatprep.subr.bf16.mxu0 %v313_v0  ;;  %24 = vmax.xlane.f32.xlu0 %v23_v3  ;;  %s286_s19 = scalar_lea.vmem %s201_s18, 32  ;;  %p291_p9 = scmp.lt.s32.totalorder %s201_s18, %s201_s18 }
  0x16   :  { %v187_v12 = vsub.s32 0, %v186_v11  ;;  %p287_p8 = scmp.ne.s32.totalorder %s201_s18, %s286_s19  ;;  %p292_p10 = scmp.lt.s32.totalorder %s286_s19, %s286_s19 }
  0x18   :  { %247 = vmatpush3.bf16.msra.mxu0 %v313_v0  ;;  %p293_p11 = por %p292_p10, %p291_p9 }
  0x19   :  { %248 = vmatprep.subr.bf16.mxu0 %v313_v0 }
  0x1a   :  { %p294_p12 = pnand %p293_p11, %p287_p8 }
  0x1c   :  { %249 = vmatpush3.bf16.msra.mxu0 %v313_v0 }
  0x1d   :  { %250 = vmatprep.subr.bf16.mxu0 %v313_v0 }
  0x20   :  { %251 = vmatpush3.bf16.msra.mxu0 %v313_v0 }
  0x21   :  { %252 = vmatprep.subr.bf16.mxu0 %v313_v0 }
  0x24   :  { %253 = vmatpush3.bf16.msra.mxu0 %v313_v0 }
  0x25   :  { %254 = vmatprep.subr.bf16.mxu0 %v313_v0 }
  0x28   :  { %255 = vmatpush3.bf16.msra.mxu0 %v313_v0 }
  0x29   :  { %256 = vmatprep.subr.bf16.mxu0 %v313_v0 }
  0x2c   :  { %257 = vmatpush3.bf16.msra.mxu0 %v313_v0 }
  0x2d   :  { %258 = vmatprep.subr.bf16.mxu0 %v313_v0 }
  0x30   :  { %259 = vmatpush3.bf16.msra.mxu0 %v313_v0 }
  0x33   :  { %91 = vmatmul.mubr.f32.vlgmr.msra.gmra.mrb[0].mxu0 %v21_v2 }
  0xa2   :  { %v25_v4 = vpop.xlane.xlu0 %24 }
  0xa3   :  { %96 = vxpose.xlu1.b32.start.end [1/1] (short) (narrow) %v25_v4, 8 }
 0x106   :  { %v241_v5 = vpop.f32.mrb[0].mxu0 }
 0x107   :  { %v242_v6 = vpop.f32.mrb[1].mxu0 }
 0x108   :  { %v243_v7 = vadd.f32 %v242_v6, %v241_v5 }
 0x10a   :  { %128 = vxpose.xlu0.b32.start.end [1/1] (short) (narrow) %v243_v7, 8 }
 0x123   :  { %v112_v8 = vpop.trf.xlu1 }
 0x124   :  { %165 = vst.msk [vmem:[#allocation2] sm:$0x1] %vm164_vm0, %v112_v8 }
 0x12b   :  { %v181_v15 = vld [vmem:[#allocation2] sm:$0x1] }
 0x18a   :  { %v144_v10 = vpop.trf.xlu0 }
 0x18b   :  { %166 = vst.msk [vmem:[#allocation3] sm:$0x1] %vm164_vm0, %v144_v10 }
 0x192   :  { %v182_v13 = vld [vmem:[#allocation3] sm:$0x1] }
 0x193   :  { %v183_v14 = vmul.f32 0.00390625, %v182_v13 }
 0x195   :  { %v188_v16 = vrot.slane %v183_v14, %v187_v12 }
 0x197   :  { %v191_v17 = vsel %vm190_vm1, %v181_v15, %v188_v16 }
 0x198   :  { %193 = vst.msk [vmem:[#allocation7] sm:$0x3] %vm192_vm2, %v191_v17 }
 0x199   :  { %297 = shalt.err (!%p294_p12)
}
 0x19a   :  { %s298_s22 = scalar_lea.hbm %s350_s1, 32 }
 0x19b   :  { %p299_p13 = scmp.ne.s32.totalorder %s350_s1, %s298_s22  ;;  %p302_p0 = scmp.lt.u32.totalorder %s298_s22, %s350_s1 }
 0x19d   :  { %p304_p1 = pnand %p302_p0, %p299_p13 }
 0x19f   :  { %307 = shalt.err (!%p304_p1)
}
 0x1a0   :  { %203 = dma.vmem_to_hbm [thread:$0]  %s201_s18, 32, %s350_s1, [#allocation6]  }
 0x1a1   :  { %310 = dma.done.wait [#allocation6], 32  }
 0x1a2   :  { %311 = vsyncadd [#allocation6], 4294967264 }
 0x1a3   :  { %207 = vsyncpa [#allocation5], 1 }
 0x1a4   :  { %208 = vsyncpa [#allocation6], 1 }

</bundles_post_ra>
